<compile_context>
chip_gen: v7x
topology: tpu7x:2x2x1
jax: 0.10.0
libtpu: 0.0.40
codegen_flags: <defaults>
</compile_context>

<pallas_src>
import functools

import jax
import jax.numpy as jnp
from jax.experimental import pallas as pl
from jax.experimental.pallas import tpu as pltpu

EPS = 1e-5            # nn.BatchNorm1d default eps
_LANE = 128
_MAX_BLOCK_B = 16384  # rows per grid step cap (>1 MB/step, VMEM-safe on v7x/v5e)


def _mtl_kernel(x_ref, w0, b0, w1, b1, wc, bc, out_ref, *, compute_dtype):
    """Fused (BN-folded) MLP: Linear+ReLU -> Linear+ReLU -> Linear head."""
    x = x_ref[...].astype(compute_dtype)          # in-kernel cast (no host pre-pass)
    h = jnp.dot(x, w0[...], preferred_element_type=jnp.float32) + b0[...]
    h = jnp.maximum(h, 0.0).astype(compute_dtype)
    h = jnp.dot(h, w1[...], preferred_element_type=jnp.float32) + b1[...]
    h = jnp.maximum(h, 0.0).astype(compute_dtype)
    o = jnp.dot(h, wc[...], preferred_element_type=jnp.float32) + bc[...]
    out_ref[...] = o.astype(out_ref.dtype)


def _fold_bn(params, compute_dtype):
    """Fold eval-mode BatchNorm1d into the following Linear (host-side, f32 math)."""
    s0 = params["bn0_g"] * jax.lax.rsqrt(params["bn0_v"] + EPS)      # (1, F)
    t0 = params["bn0_b"] - params["bn0_m"] * s0                      # (1, F)
    w0 = s0.reshape(-1, 1) * params["w0"]                            # (F, H0)
    b0 = params["b0"] + t0 @ params["w0"]                            # (1, H0)

    s1 = params["bn1_g"] * jax.lax.rsqrt(params["bn1_v"] + EPS)
    t1 = params["bn1_b"] - params["bn1_m"] * s1
    w1 = s1.reshape(-1, 1) * params["w1"]
    b1 = params["b1"] + t1 @ params["w1"]

    return dict(
        w0=w0.astype(compute_dtype), b0=b0.astype(jnp.float32),
        w1=w1.astype(compute_dtype), b1=b1.astype(jnp.float32),
        wc=params["wc"].astype(compute_dtype), bc=params["bc"].astype(jnp.float32),
    )


def _pick_block_b(B):
    """Single step for small B; otherwise evenly split into <=16K-row tiles (mult of 8)."""
    if B <= _MAX_BLOCK_B:
        return B                          # one grid step; splitting tiny problems only adds overhead
    n_steps = -(-B // _MAX_BLOCK_B)       # ceil
    per_step = -(-B // n_steps)           # even split -> minimal padding
    return -(-per_step // 8) * 8          # round up to a multiple of 8 (sublane rule)


def _vmem_limit_bytes(block_b, x_itemsize, out_itemsize):
    """Pipeline buffers are lane-padded (last dim -> 128 lanes); budget conservatively."""
    stream = 2 * block_b * _LANE * (x_itemsize + out_itemsize)   # 2 buffers per stream
    limit = int(stream * 1.25) + (6 << 20)                       # weights + headroom
    return max(32 << 20, min(limit, 56 << 20))                   # < v7x 64 MiB physical


@functools.partial(jax.jit, static_argnames=("block_b", "compute_dtype", "out_dtype"))
def earthquake_mtl_forward(x_cont, params, *, block_b=None,
                           compute_dtype=jnp.bfloat16, out_dtype=jnp.bfloat16):
    B, F = x_cont.shape
    if block_b is None:
        block_b = _pick_block_b(B)
    block_b = int(block_b)

    n_steps = -(-B // block_b)
    padded_B = n_steps * block_b
    if n_steps > 1 and block_b % 8 != 0:
        raise ValueError(f"block_b={block_b} must be a multiple of 8 when tiling")

    x = x_cont
    if padded_B != B:
        # Only when B is not divisible; padded rows compute garbage that is sliced off.
        x = jnp.pad(x, ((0, padded_B - B), (0, 0)))

    fp = _fold_bn(params, compute_dtype)
    H0 = fp["w0"].shape[1]
    H1 = fp["w1"].shape[1]
    n_out = fp["wc"].shape[1]

    def resident(shape):
        # Constant block index -> weights/biases stay resident in VMEM across the grid.
        return pl.BlockSpec(shape, lambda i: (0, 0))

    in_specs = [
        pl.BlockSpec((block_b, F), lambda i: (i, 0)),   # streamed x tile (default 2-buf)
        resident((F, H0)), resident((1, H0)),           # folded w0, b0
        resident((H0, H1)), resident((1, H1)),          # folded w1, b1
        resident((H1, n_out)), resident((1, n_out)),    # wc, bc
    ]

    out = pl.pallas_call(
        functools.partial(_mtl_kernel, compute_dtype=compute_dtype),
        out_shape=jax.ShapeDtypeStruct((padded_B, n_out), out_dtype),
        grid_spec=pltpu.PrefetchScalarGridSpec(
            num_scalar_prefetch=0,
            grid=(n_steps,),
            in_specs=in_specs,
            out_specs=pl.BlockSpec((block_b, n_out), lambda i: (i, 0)),
        ),
        compiler_params=pltpu.CompilerParams(
            dimension_semantics=("parallel",),
            vmem_limit_bytes=_vmem_limit_bytes(
                block_b, x.dtype.itemsize, jnp.dtype(out_dtype).itemsize),
        ),
    )(x, fp["w0"], fp["b0"], fp["w1"], fp["b1"], fp["wc"], fp["bc"])

    return out[:B] if padded_B != B else out


def init_params(key, n_cont=27, emb=5, hidden=(32, 32), n_out=4):
    """Deterministic synthetic parameters matching nn.Linear / BatchNorm1d shapes.

    PyTorch Linear stores weight as (out, in); we store the transpose (in, out)
    so the kernel computes x @ W + b directly. Biases / BN params are (1, dim).
    """
    F = n_cont + emb
    H0, H1 = hidden
    ks = jax.random.split(key, 8)

    def lin(k, fan_in, fan_out):
        bound = 1.0 / (fan_in ** 0.5)
        kw, kb = jax.random.split(k)
        w = jax.random.uniform(kw, (fan_in, fan_out), jnp.float32, -bound, bound)
        b = jax.random.uniform(kb, (1, fan_out), jnp.float32, -bound, bound)
        return w, b

    w0, b0 = lin(ks[0], F, H0)
    w1, b1 = lin(ks[1], H0, H1)
    wc, bc = lin(ks[2], H1, n_out)

    return dict(
        w0=w0, b0=b0, w1=w1, b1=b1, wc=wc, bc=bc,
        bn0_g=jnp.ones((1, F), jnp.float32),
        bn0_b=jnp.zeros((1, F), jnp.float32),
        bn0_m=0.1 * jax.random.normal(ks[3], (1, F), jnp.float32),
        bn0_v=1.0 + 0.05 * jax.random.uniform(ks[4], (1, F), jnp.float32),
        bn1_g=jnp.ones((1, H0), jnp.float32),
        bn1_b=jnp.zeros((1, H0), jnp.float32),
        bn1_m=0.1 * jax.random.normal(ks[5], (1, H0), jnp.float32),
        bn1_v=1.0 + 0.05 * jax.random.uniform(ks[6], (1, H0), jnp.float32),
    )


def reference_forward(x, p):
    """Pure-JAX f32 reference of the same forward pass (unfolded BN, eval mode)."""
    x = x.astype(jnp.float32)
    x = (x - p["bn0_m"]) * jax.lax.rsqrt(p["bn0_v"] + EPS) * p["bn0_g"] + p["bn0_b"]
    h = jnp.maximum(x @ p["w0"] + p["b0"], 0.0)
    h = (h - p["bn1_m"]) * jax.lax.rsqrt(p["bn1_v"] + EPS) * p["bn1_g"] + p["bn1_b"]
    h = jnp.maximum(h @ p["w1"] + p["b1"], 0.0)
    return h @ p["wc"] + p["bc"]


if __name__ == "__main__":
    B, n_cont, emb, hidden, n_out = 512, 27, 5, (32, 32), 4
    F = n_cont + emb

    key = jax.random.PRNGKey(0)
    kx, kp = jax.random.split(key)
    x_cont = jax.random.normal(kx, (B, F), jnp.float32)
    params = init_params(kp, n_cont=n_cont, emb=emb, hidden=hidden, n_out=n_out)

    ref = reference_forward(x_cont, params)

    # f32 path, explicit multi-step grid: tight numerical check of folding + fusion.
    out_f32 = jax.block_until_ready(
        earthquake_mtl_forward(x_cont, params, block_b=64,
                               compute_dtype=jnp.float32, out_dtype=jnp.float32))
    assert out_f32.shape == (B, n_out)
    assert jnp.allclose(out_f32, ref, atol=1e-4, rtol=1e-4), "f32 kernel mismatch"

    # Non-divisible batch (host-padding path): 300 rows with 128-row tiles -> 3 steps.
    x_odd = x_cont[:300]
    out_odd = jax.block_until_ready(
        earthquake_mtl_forward(x_odd, params, block_b=128,
                               compute_dtype=jnp.float32, out_dtype=jnp.float32))
    assert out_odd.shape == (300, n_out)
    assert jnp.allclose(out_odd, ref[:300], atol=1e-4, rtol=1e-4), "padded-tile mismatch"

    # Default fast path: f32 x streamed straight in, bf16 matmuls (f32 accumulation),
    # bf16 output, auto single-step block for this small B.
    out_fast = jax.block_until_ready(earthquake_mtl_forward(x_cont, params))
    assert out_fast.shape == (B, n_out)
    assert jnp.allclose(out_fast.astype(jnp.float32), ref, atol=5e-2, rtol=5e-2), \
        "bf16 kernel mismatch"

    print("KERNEL_OK")
</pallas_src>

<mosaic_0001>
module attributes {stable_mosaic.version = 11 : i64} {
  func.func @_mtl_kernel(%arg0: i32, %arg1: memref<64x32xf32, #tpu.memory_space<vmem>>, %arg2: memref<32x32xf32, #tpu.memory_space<vmem>>, %arg3: memref<1x32xf32, #tpu.memory_space<vmem>>, %arg4: memref<32x32xf32, #tpu.memory_space<vmem>>, %arg5: memref<1x32xf32, #tpu.memory_space<vmem>>, %arg6: memref<32x4xf32, #tpu.memory_space<vmem>>, %arg7: memref<1x4xf32, #tpu.memory_space<vmem>>, %arg8: memref<64x4xf32, #tpu.memory_space<vmem>>) attributes {dimension_semantics = [#tpu.dimension_semantics<parallel>], iteration_bounds = array<i64: 8>, scalar_prefetch = 0 : i64, scratch_operands = 0 : i64, tpu.core_type = #tpu.core_type<tc>, window_params = [{transform_indices = @transform_0, window_bounds = array<i64: 64, 32>}, {pipeline_mode = #tpu.pipeline_mode<synchronous>, transform_indices = @transform_1, window_bounds = array<i64: 32, 32>}, {pipeline_mode = #tpu.pipeline_mode<synchronous>, transform_indices = @transform_2, window_bounds = array<i64: 1, 32>}, {pipeline_mode = #tpu.pipeline_mode<synchronous>, transform_indices = @transform_3, window_bounds = array<i64: 32, 32>}, {pipeline_mode = #tpu.pipeline_mode<synchronous>, transform_indices = @transform_4, window_bounds = array<i64: 1, 32>}, {pipeline_mode = #tpu.pipeline_mode<synchronous>, transform_indices = @transform_5, window_bounds = array<i64: 32, 4>}, {pipeline_mode = #tpu.pipeline_mode<synchronous>, transform_indices = @transform_6, window_bounds = array<i64: 1, 4>}, {transform_indices = @transform_7, window_bounds = array<i64: 64, 4>}]} {
    %c0 = arith.constant 0 : index
    %c0_0 = arith.constant 0 : index
    %0 = vector.load %arg1[%c0, %c0_0] : memref<64x32xf32, #tpu.memory_space<vmem>>, vector<64x32xf32>
    %c0_1 = arith.constant 0 : index
    %c0_2 = arith.constant 0 : index
    %1 = vector.load %arg2[%c0_1, %c0_2] : memref<32x32xf32, #tpu.memory_space<vmem>>, vector<32x32xf32>
    %cst = arith.constant dense<0.000000e+00> : vector<64x32xf32>
    %2 = tpu.matmul %0, %1, %cst {dimension_numbers = #tpu.dot_dimension_numbers<[1], [0], [0], [1], [0, 0, 1, 1], [], []>} : vector<64x32xf32>, vector<32x32xf32>, vector<64x32xf32> -> vector<64x32xf32>
    %c0_3 = arith.constant 0 : index
    %c0_4 = arith.constant 0 : index
    %3 = vector.load %arg3[%c0_3, %c0_4] : memref<1x32xf32, #tpu.memory_space<vmem>>, vector<1x32xf32>
    %4 = vector.broadcast %3 : vector<1x32xf32> to vector<64x32xf32>
    %5 = arith.addf %2, %4 : vector<64x32xf32>
    %cst_5 = arith.constant 0.000000e+00 : f32
    %6 = vector.broadcast %cst_5 : f32 to vector<64x32xf32>
    %7 = arith.maximumf %5, %6 : vector<64x32xf32>
    %c0_6 = arith.constant 0 : index
    %c0_7 = arith.constant 0 : index
    %8 = vector.load %arg4[%c0_6, %c0_7] : memref<32x32xf32, #tpu.memory_space<vmem>>, vector<32x32xf32>
    %cst_8 = arith.constant dense<0.000000e+00> : vector<64x32xf32>
    %9 = tpu.matmul %7, %8, %cst_8 {dimension_numbers = #tpu.dot_dimension_numbers<[1], [0], [0], [1], [0, 0, 1, 1], [], []>} : vector<64x32xf32>, vector<32x32xf32>, vector<64x32xf32> -> vector<64x32xf32>
    %c0_9 = arith.constant 0 : index
    %c0_10 = arith.constant 0 : index
    %10 = vector.load %arg5[%c0_9, %c0_10] : memref<1x32xf32, #tpu.memory_space<vmem>>, vector<1x32xf32>
    %11 = vector.broadcast %10 : vector<1x32xf32> to vector<64x32xf32>
    %12 = arith.addf %9, %11 : vector<64x32xf32>
    %cst_11 = arith.constant 0.000000e+00 : f32
    %13 = vector.broadcast %cst_11 : f32 to vector<64x32xf32>
    %14 = arith.maximumf %12, %13 : vector<64x32xf32>
    %c0_12 = arith.constant 0 : index
    %c0_13 = arith.constant 0 : index
    %15 = vector.load %arg6[%c0_12, %c0_13] : memref<32x4xf32, #tpu.memory_space<vmem>>, vector<32x4xf32>
    %cst_14 = arith.constant dense<0.000000e+00> : vector<64x4xf32>
    %16 = tpu.matmul %14, %15, %cst_14 {dimension_numbers = #tpu.dot_dimension_numbers<[1], [0], [0], [1], [0, 0, 1, 1], [], []>} : vector<64x32xf32>, vector<32x4xf32>, vector<64x4xf32> -> vector<64x4xf32>
    %c0_15 = arith.constant 0 : index
    %c0_16 = arith.constant 0 : index
    %17 = vector.load %arg7[%c0_15, %c0_16] : memref<1x4xf32, #tpu.memory_space<vmem>>, vector<1x4xf32>
    %18 = vector.broadcast %17 : vector<1x4xf32> to vector<64x4xf32>
    %19 = arith.addf %16, %18 : vector<64x4xf32>
    %c0_17 = arith.constant 0 : index
    %c0_18 = arith.constant 0 : index
    %20 = vector.load %arg8[%c0_17, %c0_18] : memref<64x4xf32, #tpu.memory_space<vmem>>, vector<64x4xf32>
    tpu.vector_store %arg8[%c0_17, %c0_18], %19 {strides = array<i32>} : memref<64x4xf32, #tpu.memory_space<vmem>>, vector<64x4xf32>,
    return
  }
  func.func @transform_0(%arg0: i32) -> (i32, i32) {
    %c0_i32 = arith.constant 0 : i32
    %c0_i32_0 = arith.constant 0 : i32
    return %arg0, %c0_i32 : i32, i32
  }
  func.func @transform_1(%arg0: i32) -> (i32, i32) {
    %c0_i32 = arith.constant 0 : i32
    %c0_i32_0 = arith.constant 0 : i32
    %c0_i32_1 = arith.constant 0 : i32
    return %c0_i32, %c0_i32_0 : i32, i32
  }
  func.func @transform_2(%arg0: i32) -> (i32, i32) {
    %c0_i32 = arith.constant 0 : i32
    %c0_i32_0 = arith.constant 0 : i32
    %c0_i32_1 = arith.constant 0 : i32
    return %c0_i32, %c0_i32_0 : i32, i32
  }
  func.func @transform_3(%arg0: i32) -> (i32, i32) {
    %c0_i32 = arith.constant 0 : i32
    %c0_i32_0 = arith.constant 0 : i32
    %c0_i32_1 = arith.constant 0 : i32
    return %c0_i32, %c0_i32_0 : i32, i32
  }
  func.func @transform_4(%arg0: i32) -> (i32, i32) {
    %c0_i32 = arith.constant 0 : i32
    %c0_i32_0 = arith.constant 0 : i32
    %c0_i32_1 = arith.constant 0 : i32
    return %c0_i32, %c0_i32_0 : i32, i32
  }
  func.func @transform_5(%arg0: i32) -> (i32, i32) {
    %c0_i32 = arith.constant 0 : i32
    %c0_i32_0 = arith.constant 0 : i32
    %c0_i32_1 = arith.constant 0 : i32
    return %c0_i32, %c0_i32_0 : i32, i32
  }
  func.func @transform_6(%arg0: i32) -> (i32, i32) {
    %c0_i32 = arith.constant 0 : i32
    %c0_i32_0 = arith.constant 0 : i32
    %c0_i32_1 = arith.constant 0 : i32
    return %c0_i32, %c0_i32_0 : i32, i32
  }
  func.func @transform_7(%arg0: i32) -> (i32, i32) {
    %c0_i32 = arith.constant 0 : i32
    %c0_i32_0 = arith.constant 0 : i32
    return %arg0, %c0_i32 : i32, i32
  }
}

</mosaic_0001>

<bundles_post_ra>
// kernel: earthquake_mtl_forward.1
= control target key start
LH: loop header
LB: loop body
LE: loop exit
PB: predicated region body
PF: predicated region fallthrough
CT: control target
= control target key end

     0   :  { %s1010_s24 = smov 0   ;;  %s1111_s0 = inlined_call_operand.vmem [shape: f32[512,32], index: 0, kind: input, shape index: {}]   ;;  %s1112_s1 = inlined_call_operand.vmem [shape: f32[32,32], index: 1, kind: input, shape index: {}]   ;;  %s1113_s2 = inlined_call_operand.vmem [shape: f32[1,32], index: 2, kind: input, shape index: {}]   ;;  %s1114_s3 = inlined_call_operand.vmem [shape: f32[32,32], index: 3, kind: input, shape index: {}]   ;;  %s1115_s4 = inlined_call_operand.vmem [shape: f32[1,32], index: 4, kind: input, shape index: {}]   ;;  %s1116_s5 = inlined_call_operand.vmem [shape: f32[32,4], index: 5, kind: input, shape index: {}]   ;;  %s1117_s6 = inlined_call_operand.vmem [shape: f32[1,4], index: 6, kind: input, shape index: {}]   ;;  %s1118_s7 = inlined_call_operand.vmem [shape: f32[512,4], index: 7, kind: output, shape index: {}]  }
   0x1 LB: > { %s792_s25 = sadd.s32 4294967295, %s968_s24   ;;  %p796_p0 = scmp.ge.s32.totalorder %s968_s24, 1  ;;  %s968_s24 = sphi %s1010_s24, %s17_s24  }
   0x2   : > { %p238_p1 = scmp.lt.s32.totalorder %s968_s24, 9 }
   0x4   : > { %p239_p2 = pnand %p796_p0, %p238_p1 }
   0x5   : > { %v290_v0 = vld [vmem:[%s1112_s1] sm:$0xff] (!%p239_p2)  ;;  %v291_v1 = vld [vmem:[%s1112_s1 + $0x8] sm:$0xff] (!%p239_p2)  ;;  %v292_v2 = vld [vmem:[%s1112_s1 + $0x10] sm:$0xff] (!%p239_p2)  ;;  %s797_s9 = sshll.u32 (!%p239_p2), %s792_s25, 3  ;;  %vm301_vm0 = vcmask (!%p239_p2), 261120   ;;  %vm727_vm1 = vcmask (!%p239_p2), 31744  }
   0x6   : > { %242 = sbr.rel (%p239_p2) target bundleno = 682 (0x2aa), region = 48  ;;  %v926_v3 = vpack.c.bf16 (!%p239_p2), %v291_v1, %v290_v0  ;;  %v293_v4 = vld [vmem:[%s1112_s1 + $0x18] sm:$0xff] (!%p239_p2)  ;;  %p271_p3 = scmp.lt.s32.totalorder (!%p239_p2), %s797_s9, 63  ;;  %v439_v6 = vld [vmem:[%s1114_s3] sm:$0xff] (!%p239_p2)  ;;  %v440_v7 = vld [vmem:[%s1114_s3 + $0x8] sm:$0xff] (!%p239_p2) }
   0x7   : > { %v930_v5 = vpack.c.bf16 (!%p239_p2), %v293_v4, %v292_v2  ;;  %v934_v8 = vpack.c.bf16 (!%p239_p2), %v440_v7, %v439_v6  ;;  %v441_v17 = vld [vmem:[%s1114_s3 + $0x10] sm:$0xff] (!%p239_p2)  ;;  %v442_v18 = vld [vmem:[%s1114_s3 + $0x18] sm:$0xff] (!%p239_p2)  ;;  %v587_v20 = vld [vmem:[%s1116_s5] sm:$0xff] (!%p239_p2) }
   0x8   : > { %927 = vmatprep.subr.bf16.mxu0 (!%p239_p2), %v926_v3  ;;  %950 = vmatprep.subr.bf16.mxu1 (!%p239_p2), %v926_v3  ;;  %v938_v19 = vpack.c.bf16 (!%p239_p2), %v442_v18, %v441_v17  ;;  %v588_v21 = vld [vmem:[%s1116_s5 + $0x8] sm:$0xff] (!%p239_p2)  ;;  %v801_v23 = vld [vmem:[%s1113_s2] ss:$0 sm:$0xff] (!%p239_p2)  ;;  %v589_v48 = vld [vmem:[%s1116_s5 + $0x10] sm:$0xff] (!%p239_p2) }
   0x9   : > { %929 = vmatpush3.bf16.msra.mxu0 (!%p239_p2), %v926_v3  ;;  %952 = vmatpush3.bf16.msra.mxu1 (!%p239_p2), %v926_v3  ;;  %v942_v22 = vpack.c.bf16 (!%p239_p2), %v588_v21, %v587_v20  ;;  %v590_v49 = vld [vmem:[%s1116_s5 + $0x18] sm:$0xff] (!%p239_p2)  ;;  %v810_v51 = vld [vmem:[%s1115_s4] ss:$0 sm:$0xff] (!%p239_p2) }
   0xa   : > { %931 = vmatprep.subr.bf16.mxu0 (!%p239_p2), %v930_v5  ;;  %951 = vmatprep.subr.bf16.mxu1 (!%p239_p2), %v930_v5  ;;  %v946_v50 = vpack.c.bf16 (!%p239_p2), %v590_v49, %v589_v48 }
   0xd   : > { %s1120_s9 = smov (!%p271_p3, %s797_s9), 63  ;;  %933 = vmatpush3.bf16.msra.mxu0 %v930_v5  ;;  %953 = vmatpush3.bf16.msra.mxu1 %v930_v5 }
   0xe   : > { %s798_s16 = sshll.u32 %s1120_s9, 3  ;;  %935 = vmatprep.subr.bf16.mxu1 %v934_v8  ;;  %943 = vmatprep.subr.bf16.mxu0 %v942_v22 }
   0xf   : > { %s274_s19 = scalar_lea.vmem %s1111_s0, %s798_s16  ;;  %s280_s20 = scalar_lea.vmem %s1118_s7, %s798_s16 }
  0x10   : > { %v282_v9 = vld [vmem:[%s274_s19] sm:$0xff]  ;;  %v283_v10 = vld [vmem:[%s274_s19 + $0x8] sm:$0xff]  ;;  %v284_v12 = vld [vmem:[%s274_s19 + $0x10] sm:$0xff] }
  0x11   : > { %874 = vmatprep.mubr.msk.f32.mxu0 %vm301_vm0, %v282_v9  ;;  %v286_v11 = vld [vmem:[%s274_s19 + $0x20] sm:$0xff]  ;;  %v287_v13 = vld [vmem:[%s274_s19 + $0x28] sm:$0xff]  ;;  %v288_v14 = vld [vmem:[%s274_s19 + $0x30] sm:$0xff] }
  0x12   : > { %880 = vmatprep.mubr.msk.f32.mxu1 %vm301_vm0, %v286_v11  ;;  %875 = vmatmul.mubr.msk.f32.vlgmr.msra.gmra.mrb[0].mxu0 %vm301_vm0, %v283_v10  ;;  %v285_v15 = vld [vmem:[%s274_s19 + $0x18] sm:$0xff] }
  0x13   : > { %877 = vmatprep.mubr.msk.f32.mxu0 %vm301_vm0, %v284_v12  ;;  %881 = vmatmul.mubr.msk.f32.vlgmr.msra.gmra.mrb[0].mxu1 %vm301_vm0, %v287_v13  ;;  %v289_v16 = vld [vmem:[%s274_s19 + $0x38] sm:$0xff]  ;;  %v819_v12 = vld [vmem:[%s1117_s6] ss:$0 sm:$0xff] }
  0x14   : > { %883 = vmatprep.mubr.msk.f32.mxu1 %vm301_vm0, %v288_v14  ;;  %937 = vmatpush3.bf16.msra.mxu1 %v934_v8 }
  0x15   : > { %939 = vmatprep.subr.bf16.mxu1 %v938_v19  ;;  %945 = vmatpush3.bf16.msra.mxu0 %v942_v22 }
  0x16   : > { %878 = vmatmul.mubr.msk.f32.gmra.mrb[2].mxu0 %vm301_vm0, %v285_v15  ;;  %947 = vmatprep.subr.bf16.mxu0 %v946_v50 }
  0x17   : > { %884 = vmatmul.mubr.msk.f32.gmra.mrb[2].mxu1 %vm301_vm0, %v289_v16 }
  0x18   : > { %941 = vmatpush3.bf16.msra.mxu1 %v938_v19 }
  0x19   : > { %949 = vmatpush3.bf16.msra.mxu0 %v946_v50 }
  0xe5   : > { %v876_v24 = vpop.f32.mrb[0].mxu0 }
  0xe6   : > { %v398_v25 = vadd.f32 %v876_v24, %v801_v23  ;;  %v392_v26 = vpop.f32.mrb[1].mxu0  ;;  %v882_v27 = vpop.f32.mrb[0].mxu1 }
  0xe7   : > { %v393_v28 = vadd.f32 %v801_v23, %v392_v26  ;;  %v412_v29 = vpop.f32.mrb[1].mxu1  ;;  %v418_v43 = vadd.f32 %v882_v27, %v801_v23 }
  0xe8   : > { %v413_v32 = vadd.f32 %v801_v23, %v412_v29  ;;  %v432_v33 = vmax.f32 %v398_v25, 0.0 }
  0xe9   : > { %v431_v30 = vmax.f32 %v393_v28, 0.0  ;;  %v879_v31 = vpop.f32.mrb[2].mxu0  ;;  %v436_v45 = vmax.f32 %v418_v43, 0.0 }
  0xea   : > { %v408_v34 = vadd.f32 %v879_v31, %v801_v23  ;;  %v402_v35 = vpop.f32.mrb[3].mxu0  ;;  %v885_v36 = vpop.f32.mrb[2].mxu1  ;;  %v435_v40 = vmax.f32 %v413_v32, 0.0 }
  0xeb   : > { %v403_v37 = vadd.f32 %v801_v23, %v402_v35  ;;  %894 = vmatprep.mubr.msk.f32.mxu1 %vm301_vm0, %v431_v30  ;;  %v422_v38 = vpop.f32.mrb[3].mxu1  ;;  %v428_v46 = vadd.f32 %v885_v36, %v801_v23 }
  0xec   : > { %895 = vmatmul.mubr.msk.f32.vlgmr.msra.gmra.mrb[4].mxu1 %vm301_vm0, %v432_v33  ;;  %v423_v41 = vadd.f32 %v801_v23, %v422_v38  ;;  %v434_v42 = vmax.f32 %v408_v34, 0.0 }
  0xed   : > { %v433_v39 = vmax.f32 %v403_v37, 0.0  ;;  %v438_v47 = vmax.f32 %v428_v46, 0.0 }
  0xee   : > { %v437_v44 = vmax.f32 %v423_v41, 0.0 }
  0xef   : > { %897 = vmatprep.mubr.msk.f32.mxu1 %vm301_vm0, %v433_v39 }
  0xf0   : > { %898 = vmatmul.mubr.msk.f32.gmra.mrb[6].mxu1 %vm301_vm0, %v434_v42 }
  0xf1   : > { %900 = vmatprep.mubr.msk.f32.mxu1 %vm301_vm0, %v435_v40 }
  0xf4   : > { %901 = vmatmul.mubr.msk.f32.gmra.mrb[8].mxu1 %vm301_vm0, %v436_v45 }
  0xf5   : > { %903 = vmatprep.mubr.msk.f32.mxu1 %vm301_vm0, %v437_v44 }
  0xf8   : > { %904 = vmatmul.mubr.msk.f32.gmra.mrb[10].mxu1 %vm301_vm0, %v438_v47 }
 0x1bf   : > { %v896_v52 = vpop.f32.mrb[4].mxu1 }
 0x1c0   : > { %v546_v53 = vadd.f32 %v896_v52, %v810_v51  ;;  %v540_v54 = vpop.f32.mrb[5].mxu1 }
 0x1c1   : > { %v541_v55 = vadd.f32 %v810_v51, %v540_v54 }
 0x1c2   : > { %v580_v58 = vmax.f32 %v546_v53, 0.0 }
 0x1c3   : > { %v579_v56 = vmax.f32 %v541_v55, 0.0  ;;  %v899_v57 = vpop.f32.mrb[6].mxu1 }
 0x1c4   : > { %v556_v59 = vadd.f32 %v899_v57, %v810_v51  ;;  %v550_v60 = vpop.f32.mrb[7].mxu1 }
 0x1c5   : > { %v551_v61 = vadd.f32 %v810_v51, %v550_v60  ;;  %914 = vmatprep.mubr.msk.f32.mxu0 %vm301_vm0, %v579_v56 }
 0x1c6   : > { %915 = vmatmul.mubr.msk.f32.vlgmr.msra.gmra.mrb[4].mxu0 %vm301_vm0, %v580_v58  ;;  %v582_v0 = vmax.f32 %v556_v59, 0.0 }
 0x1c7   : > { %v581_v62 = vmax.f32 %v551_v61, 0.0  ;;  %v902_v63 = vpop.f32.mrb[8].mxu1 }
 0x1c8   : > { %v566_v1 = vadd.f32 %v902_v63, %v810_v51  ;;  %v560_v2 = vpop.f32.mrb[9].mxu1 }
 0x1c9   : > { %v561_v3 = vadd.f32 %v810_v51, %v560_v2  ;;  %917 = vmatprep.mubr.msk.f32.mxu0 %vm301_vm0, %v581_v62 }
 0x1ca   : > { %918 = vmatmul.mubr.msk.f32.gmra.mrb[6].mxu0 %vm301_vm0, %v582_v0  ;;  %v584_v6 = vmax.f32 %v566_v1, 0.0 }
 0x1cb   : > { %v583_v4 = vmax.f32 %v561_v3, 0.0  ;;  %v905_v5 = vpop.f32.mrb[10].mxu1 }
 0x1cc   : > { %v576_v7 = vadd.f32 %v905_v5, %v810_v51  ;;  %v570_v8 = vpop.f32.mrb[11].mxu1 }
 0x1cd   : > { %v571_v9 = vadd.f32 %v810_v51, %v570_v8  ;;  %920 = vmatprep.mubr.msk.f32.mxu0 %vm301_vm0, %v583_v4 }
 0x1ce   : > { %921 = vmatmul.mubr.msk.f32.gmra.mrb[8].mxu0 %vm301_vm0, %v584_v6  ;;  %v586_v11 = vmax.f32 %v576_v7, 0.0 }
 0x1cf   : > { %v585_v10 = vmax.f32 %v571_v9, 0.0 }
 0x1d1   : > { %923 = vmatprep.mubr.msk.f32.mxu0 %vm301_vm0, %v585_v10 }
 0x1d2   : > { %924 = vmatmul.mubr.msk.f32.gmra.mrb[10].mxu0 %vm301_vm0, %v586_v11 }
 0x299   : > { %v916_v13 = vpop.f32.mrb[4].mxu0 }
 0x29a   : > { %v694_v14 = vadd.f32 %v916_v13, %v819_v12  ;;  %v688_v15 = vpop.f32.mrb[5].mxu0 }
 0x29b   : > { %v689_v16 = vadd.f32 %v819_v12, %v688_v15 }
 0x29c   : > { %729 = vst.msk [vmem:[%s280_s20 + $0x8] sm:$0xff] %vm727_vm1, %v694_v14 }
 0x29d   : > { %728 = vst.msk [vmem:[%s280_s20] sm:$0xff] %vm727_vm1, %v689_v16  ;;  %v919_v17 = vpop.f32.mrb[6].mxu0 }
 0x29e   : > { %v704_v18 = vadd.f32 %v919_v17, %v819_v12  ;;  %v698_v19 = vpop.f32.mrb[7].mxu0 }
 0x29f   : > { %v699_v20 = vadd.f32 %v819_v12, %v698_v19 }
 0x2a0   : > { %731 = vst.msk [vmem:[%s280_s20 + $0x18] sm:$0xff] %vm727_vm1, %v704_v18 }
 0x2a1   : > { %730 = vst.msk [vmem:[%s280_s20 + $0x10] sm:$0xff] %vm727_vm1, %v699_v20  ;;  %v922_v21 = vpop.f32.mrb[8].mxu0 }
 0x2a2   : > { %v714_v22 = vadd.f32 %v922_v21, %v819_v12  ;;  %v708_v23 = vpop.f32.mrb[9].mxu0 }
 0x2a3   : > { %v709_v24 = vadd.f32 %v819_v12, %v708_v23 }
 0x2a4   : > { %733 = vst.msk [vmem:[%s280_s20 + $0x28] sm:$0xff] %vm727_vm1, %v714_v22 }
 0x2a5   : > { %732 = vst.msk [vmem:[%s280_s20 + $0x20] sm:$0xff] %vm727_vm1, %v709_v24  ;;  %v925_v25 = vpop.f32.mrb[10].mxu0 }
 0x2a6   : > { %v724_v26 = vadd.f32 %v925_v25, %v819_v12  ;;  %v718_v27 = vpop.f32.mrb[11].mxu0 }
 0x2a7   : > { %v719_v28 = vadd.f32 %v819_v12, %v718_v27 }
 0x2a8   : > { %735 = vst.msk [vmem:[%s280_s20 + $0x38] sm:$0xff] %vm727_vm1, %v724_v26 }
 0x2a9   : > { %734 = vst.msk [vmem:[%s280_s20 + $0x30] sm:$0xff] %vm727_vm1, %v719_v28 }
 0x2aa PF: > { %s17_s24 = sadd.s32 1, %s968_s24  }
 0x2ab   : > { %p14_p4 = scmp.ge.s32.totalorder %s17_s24, 10  }
 0x2ad   :  { %16 = sbr.rel (!%p14_p4) target bundleno = 1 (0x1), region = 78 }

</bundles_post_ra>
